<compile_context>
chip_gen: v5e
topology: v5e:2x2
jax: 0.10.0
libtpu: 0.0.40
codegen_flags: <defaults>
</compile_context>

<pallas_src>
import functools

import jax
import jax.numpy as jnp
from jax import lax
from jax.experimental import pallas as pl
from jax.experimental.pallas import tpu as pltpu


def _round_up(a, b):
    return (a + b - 1) // b * b


# ---------------------------------------------------------------------------
# Pallas kernel: fused LayerNorm over 4C (presented as two 2C halves) +
# Linear(4C -> 2C, no bias) as two accumulated partial matmuls.
# ---------------------------------------------------------------------------
def _ln_linear_kernel(h0_ref, h1_ref, g0_ref, g1_ref, b0_ref, b1_ref,
                      w0_ref, w1_ref, o_ref, *, eps, n_feat):
    # h0/h1: (tm, 2C)   g*/b*: (1, 2C)   w0/w1: (2C, Cout_p)   o: (tm, Cout_p)
    h0 = h0_ref[...].astype(jnp.float32)
    h1 = h1_ref[...].astype(jnp.float32)

    inv_n = 1.0 / n_feat
    # LayerNorm statistics over the full 4C features (both halves); biased
    # variance + eps -> matches PyTorch nn.LayerNorm.
    mean = (jnp.sum(h0, axis=-1, keepdims=True)
            + jnp.sum(h1, axis=-1, keepdims=True)) * inv_n
    c0 = h0 - mean
    c1 = h1 - mean
    var = (jnp.sum(c0 * c0, axis=-1, keepdims=True)
           + jnp.sum(c1 * c1, axis=-1, keepdims=True)) * inv_n
    rstd = lax.rsqrt(var + eps)              # EUP path, off the VALU

    g0 = g0_ref[...].astype(jnp.float32)
    g1 = g1_ref[...].astype(jnp.float32)
    b0 = b0_ref[...].astype(jnp.float32)
    b1 = b1_ref[...].astype(jnp.float32)

    y0 = (c0 * rstd) * g0 + b0
    y1 = (c1 * rstd) * g1 + b1

    # Feed the MXU in the weight's native dtype (bf16 x bf16 -> f32 is the
    # native path); accumulation stays in f32.
    y0 = y0.astype(w0_ref.dtype)
    y1 = y1.astype(w1_ref.dtype)
    acc = jnp.dot(y0, w0_ref[...], preferred_element_type=jnp.float32)
    acc = acc + jnp.dot(y1, w1_ref[...], preferred_element_type=jnp.float32)
    o_ref[...] = acc.astype(o_ref.dtype)


def _pick_tile(R, C2, Cout_p, itemsize, vmem_budget_bytes=24 << 20):
    """Largest row tile (<=512, multiple of 8) whose double-buffered working
    set stays comfortably inside the default scoped VMEM."""
    # Resident parameter bytes (single-buffered: constant index_map).
    param_bytes = (2 * C2 * Cout_p + 4 * C2) * itemsize
    # Per-row bytes: two input halves + output, each double-buffered, plus
    # ~3x f32 intermediates for the LN math.
    per_row = (2 * (2 * C2 + Cout_p)) * itemsize + 3 * (2 * C2) * 4
    tm = max(8, (vmem_budget_bytes - param_bytes) // max(per_row, 1))
    tm = min(512, tm, _round_up(R, 8))
    return _round_up(tm, 8) if tm % 8 else tm


def _ln_linear(h0, h1, gamma, beta, w, *, eps=1e-5, tm=None):
    """h0/h1: (R, 2C) halves of the merged patch.  Returns (R, 2C_out)."""
    R, C2 = h0.shape
    C4 = 2 * C2
    Cout = w.shape[1]

    # Lane-dense output: pad the weight's N dim to a multiple of 128 so the
    # store path is unmasked; slice the result afterwards.
    Cout_p = _round_up(Cout, 128)
    w_p = w if Cout_p == Cout else jnp.pad(w, ((0, 0), (0, Cout_p - Cout)))

    itemsize = jnp.dtype(h0.dtype).itemsize
    if tm is None:
        tm = _pick_tile(R, C2, Cout_p, itemsize)

    R_pad = _round_up(R, tm)
    if R_pad != R:
        h0 = jnp.pad(h0, ((0, R_pad - R), (0, 0)))
        h1 = jnp.pad(h1, ((0, R_pad - R), (0, 0)))

    g0 = gamma[:C2].reshape(1, C2)
    g1 = gamma[C2:].reshape(1, C2)
    b0 = beta[:C2].reshape(1, C2)
    b1 = beta[C2:].reshape(1, C2)
    w0 = w_p[:C2]
    w1 = w_p[C2:]

    grid = (R_pad // tm,)
    cost = pl.CostEstimate(
        flops=int(2 * R_pad * C4 * Cout_p),
        transcendentals=int(R_pad),
        bytes_accessed=int((R_pad * C4 + C4 * Cout_p + R_pad * Cout_p) * itemsize),
    )

    out = pl.pallas_call(
        functools.partial(_ln_linear_kernel, eps=eps, n_feat=float(C4)),
        out_shape=jax.ShapeDtypeStruct((R_pad, Cout_p), h0.dtype),
        grid_spec=pltpu.PrefetchScalarGridSpec(
            num_scalar_prefetch=0,
            grid=grid,
            in_specs=[
                pl.BlockSpec((tm, C2), lambda i: (i, 0)),      # half 0 (even lat row)
                pl.BlockSpec((tm, C2), lambda i: (i, 0)),      # half 1 (odd lat row)
                pl.BlockSpec((1, C2), lambda i: (0, 0)),       # gamma[:2C]
                pl.BlockSpec((1, C2), lambda i: (0, 0)),       # gamma[2C:]
                pl.BlockSpec((1, C2), lambda i: (0, 0)),       # beta[:2C]
                pl.BlockSpec((1, C2), lambda i: (0, 0)),       # beta[2C:]
                pl.BlockSpec((C2, Cout_p), lambda i: (0, 0)),  # W[:2C, :]
                pl.BlockSpec((C2, Cout_p), lambda i: (0, 0)),  # W[2C:, :]
            ],
            out_specs=pl.BlockSpec((tm, Cout_p), lambda i: (i, 0)),
        ),
        compiler_params=pltpu.CompilerParams(
            dimension_semantics=("parallel",),
        ),
        cost_estimate=cost,
    )(h0, h1, g0, g1, b0, b1, w0, w1)

    return out[:R, :Cout]


# ---------------------------------------------------------------------------
# DownSample forward (layout glue in plain JAX + Pallas hot path)
# ---------------------------------------------------------------------------
def downsample_forward(x, params, input_resolution, output_resolution, *, eps=1e-5):
    """
    x: (B, N, C) with N = in_pl * in_lat * in_lon
    returns: (B, out_pl * out_lat * out_lon, 2*C)
    """
    B, N, C = x.shape
    in_pl, in_lat, in_lon = input_resolution
    out_pl, out_lat, out_lon = output_resolution
    assert in_pl == out_pl
    assert N == in_pl * in_lat * in_lon

    h_pad = out_lat * 2 - in_lat
    w_pad = out_lon * 2 - in_lon
    pad_top = h_pad // 2
    pad_bottom = h_pad - pad_top
    pad_left = w_pad // 2
    pad_right = w_pad - pad_left

    # (B, N, C) -> (B, pl, lat, lon, C), zero-pad lat/lon (pl unchanged).
    x = x.reshape(B, in_pl, in_lat, in_lon, C)
    x = jnp.pad(
        x,
        ((0, 0), (0, 0), (pad_top, pad_bottom), (pad_left, pad_right), (0, 0)),
    )

    # 2x2 patch merge WITHOUT materializing the transposed (R, 4C) slab:
    # even / odd latitude rows each yield a token-major (R, 2C) slab via a
    # strided slice + pure reshapes (contiguous lon pairs -> 2C lanes).
    # 4C order of the merged token = [lat0lon0, lat0lon1, lat1lon0, lat1lon1],
    # so half0 = features [0:2C], half1 = features [2C:4C].
    M = out_pl * out_lat * out_lon
    R = B * M
    half0 = x[:, :, 0::2].reshape(R, 2 * C)
    half1 = x[:, :, 1::2].reshape(R, 2 * C)

    out2d = _ln_linear(
        half0, half1, params["gamma"], params["beta"], params["w"], eps=eps
    )
    return out2d.reshape(B, M, 2 * C)


# ---------------------------------------------------------------------------
# Pure-JAX reference for a sanity check
# ---------------------------------------------------------------------------
def downsample_reference(x, params, input_resolution, output_resolution):
    B, N, C = x.shape
    in_pl, in_lat, in_lon = input_resolution
    out_pl, out_lat, out_lon = output_resolution
    h_pad = out_lat * 2 - in_lat
    w_pad = out_lon * 2 - in_lon
    pad_top, pad_bottom = h_pad // 2, h_pad - h_pad // 2
    pad_left, pad_right = w_pad // 2, w_pad - w_pad // 2

    x = x.reshape(B, in_pl, in_lat, in_lon, C)
    x = jnp.pad(
        x, ((0, 0), (0, 0), (pad_top, pad_bottom), (pad_left, pad_right), (0, 0))
    )
    x = x.reshape(B, in_pl, out_lat, 2, out_lon, 2, C)
    x = jnp.transpose(x, (0, 1, 2, 4, 3, 5, 6))
    x = x.reshape(B, out_pl * out_lat * out_lon, 4 * C).astype(jnp.float32)

    mean = jnp.mean(x, axis=-1, keepdims=True)
    var = jnp.mean((x - mean) ** 2, axis=-1, keepdims=True)
    xn = (x - mean) / jnp.sqrt(var + 1e-5)
    y = xn * params["gamma"] + params["beta"]
    return jnp.einsum("bmc,cd->bmd", y, params["w"].astype(jnp.float32))


# ---------------------------------------------------------------------------
if __name__ == "__main__":
    # Small shapes consistent with the module (both lat and lon padding used).
    in_dim = 32                        # C ; LayerNorm over 4C = 128 lanes
    input_resolution = (2, 7, 7)       # (pl, lat, lon)
    output_resolution = (2, 4, 4)
    B = 2
    N = input_resolution[0] * input_resolution[1] * input_resolution[2]

    key = jax.random.PRNGKey(0)
    kx, kw, kg, kb = jax.random.split(key, 4)

    x = jax.random.normal(kx, (B, N, in_dim), dtype=jnp.float32)

    # Deterministic synthetic parameters (shapes from the module __init__).
    params = {
        # nn.Linear(4C, 2C, bias=False) weight used as (in, out) for x @ W
        "w": jax.random.normal(kw, (4 * in_dim, 2 * in_dim), dtype=jnp.float32)
        * 0.02,
        # nn.LayerNorm(4C) affine params
        "gamma": 1.0
        + 0.1 * jax.random.normal(kg, (4 * in_dim,), dtype=jnp.float32),
        "beta": 0.1 * jax.random.normal(kb, (4 * in_dim,), dtype=jnp.float32),
    }

    fwd = jax.jit(
        functools.partial(
            downsample_forward,
            input_resolution=input_resolution,
            output_resolution=output_resolution,
        )
    )
    out = jax.block_until_ready(fwd(x, params))

    ref = downsample_reference(x, params, input_resolution, output_resolution)
    M = output_resolution[0] * output_resolution[1] * output_resolution[2]
    assert out.shape == (B, M, 2 * in_dim), out.shape
    assert jnp.allclose(out, ref, atol=1e-4, rtol=1e-4), (
        float(jnp.max(jnp.abs(out - ref)))
    )

    print("KERNEL_OK")
</pallas_src>

<mosaic_0001>
module attributes {stable_mosaic.version = 11 : i64} {
  func.func @_ln_linear_kernel(%arg0: i32, %arg1: memref<64x64xf32, #tpu.memory_space<vmem>>, %arg2: memref<64x64xf32, #tpu.memory_space<vmem>>, %arg3: memref<1x64xf32, #tpu.memory_space<vmem>>, %arg4: memref<1x64xf32, #tpu.memory_space<vmem>>, %arg5: memref<1x64xf32, #tpu.memory_space<vmem>>, %arg6: memref<1x64xf32, #tpu.memory_space<vmem>>, %arg7: memref<64x128xf32, #tpu.memory_space<vmem>>, %arg8: memref<64x128xf32, #tpu.memory_space<vmem>>, %arg9: memref<64x128xf32, #tpu.memory_space<vmem>>) attributes {dimension_semantics = [#tpu.dimension_semantics<parallel>], iteration_bounds = array<i64: 1>, scalar_prefetch = 0 : i64, scratch_operands = 0 : i64, tpu.core_type = #tpu.core_type<tc>, window_params = [{transform_indices = @transform_0, window_bounds = array<i64: 64, 64>}, {transform_indices = @transform_1, window_bounds = array<i64: 64, 64>}, {pipeline_mode = #tpu.pipeline_mode<synchronous>, transform_indices = @transform_2, window_bounds = array<i64: 1, 64>}, {pipeline_mode = #tpu.pipeline_mode<synchronous>, transform_indices = @transform_3, window_bounds = array<i64: 1, 64>}, {pipeline_mode = #tpu.pipeline_mode<synchronous>, transform_indices = @transform_4, window_bounds = array<i64: 1, 64>}, {pipeline_mode = #tpu.pipeline_mode<synchronous>, transform_indices = @transform_5, window_bounds = array<i64: 1, 64>}, {pipeline_mode = #tpu.pipeline_mode<synchronous>, transform_indices = @transform_6, window_bounds = array<i64: 64, 128>}, {pipeline_mode = #tpu.pipeline_mode<synchronous>, transform_indices = @transform_7, window_bounds = array<i64: 64, 128>}, {transform_indices = @transform_8, window_bounds = array<i64: 64, 128>}]} {
    %c0 = arith.constant 0 : index
    %c0_0 = arith.constant 0 : index
    %0 = vector.load %arg1[%c0, %c0_0] : memref<64x64xf32, #tpu.memory_space<vmem>>, vector<64x64xf32>
    %c0_1 = arith.constant 0 : index
    %c0_2 = arith.constant 0 : index
    %1 = vector.load %arg2[%c0_1, %c0_2] : memref<64x64xf32, #tpu.memory_space<vmem>>, vector<64x64xf32>
    %cst = arith.constant dense<0.000000e+00> : vector<64xf32>
    %2 = vector.multi_reduction <add>, %0, %cst [1] : vector<64x64xf32> to vector<64xf32>
    %3 = vector.shape_cast %2 : vector<64xf32> to vector<64x1xf32>
    %cst_3 = arith.constant dense<0.000000e+00> : vector<64xf32>
    %4 = vector.multi_reduction <add>, %1, %cst_3 [1] : vector<64x64xf32> to vector<64xf32>
    %5 = vector.shape_cast %4 : vector<64xf32> to vector<64x1xf32>
    %6 = arith.addf %3, %5 : vector<64x1xf32>
    %cst_4 = arith.constant 7.812500e-03 : f32
    %7 = vector.broadcast %cst_4 : f32 to vector<64x1xf32>
    %8 = arith.mulf %6, %7 : vector<64x1xf32>
    %9 = vector.broadcast %8 : vector<64x1xf32> to vector<64x64xf32>
    %10 = arith.subf %0, %9 : vector<64x64xf32>
    %11 = vector.broadcast %8 : vector<64x1xf32> to vector<64x64xf32>
    %12 = arith.subf %1, %11 : vector<64x64xf32>
    %13 = arith.mulf %10, %10 : vector<64x64xf32>
    %cst_5 = arith.constant dense<0.000000e+00> : vector<64xf32>
    %14 = vector.multi_reduction <add>, %13, %cst_5 [1] : vector<64x64xf32> to vector<64xf32>
    %15 = vector.shape_cast %14 : vector<64xf32> to vector<64x1xf32>
    %16 = arith.mulf %12, %12 : vector<64x64xf32>
    %cst_6 = arith.constant dense<0.000000e+00> : vector<64xf32>
    %17 = vector.multi_reduction <add>, %16, %cst_6 [1] : vector<64x64xf32> to vector<64xf32>
    %18 = vector.shape_cast %17 : vector<64xf32> to vector<64x1xf32>
    %19 = arith.addf %15, %18 : vector<64x1xf32>
    %cst_7 = arith.constant 7.812500e-03 : f32
    %20 = vector.broadcast %cst_7 : f32 to vector<64x1xf32>
    %21 = arith.mulf %19, %20 : vector<64x1xf32>
    %cst_8 = arith.constant 9.99999974E-6 : f32
    %22 = vector.broadcast %cst_8 : f32 to vector<64x1xf32>
    %23 = arith.addf %21, %22 : vector<64x1xf32>
    %24 = math.rsqrt %23 : vector<64x1xf32>
    %c0_9 = arith.constant 0 : index
    %c0_10 = arith.constant 0 : index
    %25 = vector.load %arg3[%c0_9, %c0_10] : memref<1x64xf32, #tpu.memory_space<vmem>>, vector<1x64xf32>
    %c0_11 = arith.constant 0 : index
    %c0_12 = arith.constant 0 : index
    %26 = vector.load %arg4[%c0_11, %c0_12] : memref<1x64xf32, #tpu.memory_space<vmem>>, vector<1x64xf32>
    %c0_13 = arith.constant 0 : index
    %c0_14 = arith.constant 0 : index
    %27 = vector.load %arg5[%c0_13, %c0_14] : memref<1x64xf32, #tpu.memory_space<vmem>>, vector<1x64xf32>
    %c0_15 = arith.constant 0 : index
    %c0_16 = arith.constant 0 : index
    %28 = vector.load %arg6[%c0_15, %c0_16] : memref<1x64xf32, #tpu.memory_space<vmem>>, vector<1x64xf32>
    %29 = vector.broadcast %24 : vector<64x1xf32> to vector<64x64xf32>
    %30 = arith.mulf %10, %29 : vector<64x64xf32>
    %31 = vector.broadcast %25 : vector<1x64xf32> to vector<64x64xf32>
    %32 = arith.mulf %30, %31 : vector<64x64xf32>
    %33 = vector.broadcast %27 : vector<1x64xf32> to vector<64x64xf32>
    %34 = arith.addf %32, %33 : vector<64x64xf32>
    %35 = vector.broadcast %24 : vector<64x1xf32> to vector<64x64xf32>
    %36 = arith.mulf %12, %35 : vector<64x64xf32>
    %37 = vector.broadcast %26 : vector<1x64xf32> to vector<64x64xf32>
    %38 = arith.mulf %36, %37 : vector<64x64xf32>
    %39 = vector.broadcast %28 : vector<1x64xf32> to vector<64x64xf32>
    %40 = arith.addf %38, %39 : vector<64x64xf32>
    %c0_17 = arith.constant 0 : index
    %c0_18 = arith.constant 0 : index
    %41 = vector.load %arg7[%c0_17, %c0_18] : memref<64x128xf32, #tpu.memory_space<vmem>>, vector<64x128xf32>
    %cst_19 = arith.constant dense<0.000000e+00> : vector<64x128xf32>
    %42 = tpu.matmul %34, %41, %cst_19 {dimension_numbers = #tpu.dot_dimension_numbers<[1], [0], [0], [1], [0, 0, 1, 1], [], []>} : vector<64x64xf32>, vector<64x128xf32>, vector<64x128xf32> -> vector<64x128xf32>
    %c0_20 = arith.constant 0 : index
    %c0_21 = arith.constant 0 : index
    %43 = vector.load %arg8[%c0_20, %c0_21] : memref<64x128xf32, #tpu.memory_space<vmem>>, vector<64x128xf32>
    %cst_22 = arith.constant dense<0.000000e+00> : vector<64x128xf32>
    %44 = tpu.matmul %40, %43, %cst_22 {dimension_numbers = #tpu.dot_dimension_numbers<[1], [0], [0], [1], [0, 0, 1, 1], [], []>} : vector<64x64xf32>, vector<64x128xf32>, vector<64x128xf32> -> vector<64x128xf32>
    %45 = arith.addf %42, %44 : vector<64x128xf32>
    %c0_23 = arith.constant 0 : index
    %c0_24 = arith.constant 0 : index
    %46 = vector.load %arg9[%c0_23, %c0_24] : memref<64x128xf32, #tpu.memory_space<vmem>>, vector<64x128xf32>
    tpu.vector_store %arg9[%c0_23, %c0_24], %45 {strides = array<i32>} : memref<64x128xf32, #tpu.memory_space<vmem>>, vector<64x128xf32>,
    return
  }
  func.func @transform_0(%arg0: i32) -> (i32, i32) {
    %c0_i32 = arith.constant 0 : i32
    %c0_i32_0 = arith.constant 0 : i32
    return %arg0, %c0_i32 : i32, i32
  }
  func.func @transform_1(%arg0: i32) -> (i32, i32) {
    %c0_i32 = arith.constant 0 : i32
    %c0_i32_0 = arith.constant 0 : i32
    return %arg0, %c0_i32 : i32, i32
  }
  func.func @transform_2(%arg0: i32) -> (i32, i32) {
    %c0_i32 = arith.constant 0 : i32
    %c0_i32_0 = arith.constant 0 : i32
    %c0_i32_1 = arith.constant 0 : i32
    return %c0_i32, %c0_i32_0 : i32, i32
  }
  func.func @transform_3(%arg0: i32) -> (i32, i32) {
    %c0_i32 = arith.constant 0 : i32
    %c0_i32_0 = arith.constant 0 : i32
    %c0_i32_1 = arith.constant 0 : i32
    return %c0_i32, %c0_i32_0 : i32, i32
  }
  func.func @transform_4(%arg0: i32) -> (i32, i32) {
    %c0_i32 = arith.constant 0 : i32
    %c0_i32_0 = arith.constant 0 : i32
    %c0_i32_1 = arith.constant 0 : i32
    return %c0_i32, %c0_i32_0 : i32, i32
  }
  func.func @transform_5(%arg0: i32) -> (i32, i32) {
    %c0_i32 = arith.constant 0 : i32
    %c0_i32_0 = arith.constant 0 : i32
    %c0_i32_1 = arith.constant 0 : i32
    return %c0_i32, %c0_i32_0 : i32, i32
  }
  func.func @transform_6(%arg0: i32) -> (i32, i32) {
    %c0_i32 = arith.constant 0 : i32
    %c0_i32_0 = arith.constant 0 : i32
    %c0_i32_1 = arith.constant 0 : i32
    return %c0_i32, %c0_i32_0 : i32, i32
  }
  func.func @transform_7(%arg0: i32) -> (i32, i32) {
    %c0_i32 = arith.constant 0 : i32
    %c0_i32_0 = arith.constant 0 : i32
    %c0_i32_1 = arith.constant 0 : i32
    return %c0_i32, %c0_i32_0 : i32, i32
  }
  func.func @transform_8(%arg0: i32) -> (i32, i32) {
    %c0_i32 = arith.constant 0 : i32
    %c0_i32_0 = arith.constant 0 : i32
    return %arg0, %c0_i32 : i32, i32
  }
}

</mosaic_0001>

<bundles_post_ra>
// kernel: downsample_forward.1
= control target key start
LH: loop header
LB: loop body
LE: loop exit
PB: predicated region body
PF: predicated region fallthrough
CT: control target
= control target key end

     0   :  { %vm46_vm0 = vcmask 523264   ;;  %s1009_s0 = inlined_call_operand.vmem [shape: f32[64,64], index: 0, kind: input, shape index: {}]   ;;  %s1010_s1 = inlined_call_operand.vmem [shape: f32[64,64], index: 1, kind: input, shape index: {}]   ;;  %s1011_s2 = inlined_call_operand.vmem [shape: f32[1,64], index: 2, kind: input, shape index: {}]   ;;  %s1012_s3 = inlined_call_operand.vmem [shape: f32[1,64], index: 3, kind: input, shape index: {}]   ;;  %s1013_s4 = inlined_call_operand.vmem [shape: f32[1,64], index: 4, kind: input, shape index: {}]   ;;  %s1014_s5 = inlined_call_operand.vmem [shape: f32[1,64], index: 5, kind: input, shape index: {}]   ;;  %s1015_s6 = inlined_call_operand.vmem [shape: f32[64,128], index: 6, kind: input, shape index: {}]   ;;  %s1016_s7 = inlined_call_operand.vmem [shape: f32[64,128], index: 7, kind: input, shape index: {}]   ;;  %s1017_s8 = inlined_call_operand.hbm [shape: f32[64,128], index: 8, kind: output, shape index: {}]  }
   0x1   :  { %v34_v0 = vld [vmem:[%s1009_s0 + $0x20] sm:$0xff]  ;;  %v669_v2 = vld [vmem:[%s1009_s0 + $0x28] sm:$0xff] }
   0x2   :  { %v30_v1 = vld [vmem:[%s1009_s0] sm:$0xff]  ;;  %v59_v3 = vsel %vm46_vm0, %v34_v0, 0.0  ;;  %v62_v5 = vsel %vm46_vm0, %v669_v2, 0.0  ;;  %v684_v8 = vld [vmem:[%s1010_s1 + $0x28] sm:$0xff] }
   0x3   :  { %v47_v4 = vsel %vm46_vm0, %v30_v1, 0.0  ;;  %60 = vadd.xlane.f32.xlu0 %v59_v3  ;;  %63 = vadd.xlane.f32.xlu2 %v62_v5  ;;  %v42_v6 = vld [vmem:[%s1010_s1 + $0x20] sm:$0xff] }
   0x4   :  { %48 = vadd.xlane.f32.xlu1 %v47_v4  ;;  %v38_v7 = vld [vmem:[%s1010_s1] sm:$0xff]  ;;  %v83_v9 = vsel %vm46_vm0, %v42_v6, 0.0 }
   0x5   :  { %v71_v10 = vsel %vm46_vm0, %v38_v7, 0.0 }
   0x6   :  { %13 = vsyncpa [#allocation3], 0  ;;  %v86_v11 = vsel %vm46_vm0, %v684_v8, 0.0  ;;  %v693_v12 = vld [vmem:[%s1009_s0 + $0x8] sm:$0xff]  ;;  %v703_v14 = vld [vmem:[%s1009_s0 + $0x30] sm:$0xff]  ;;  %s519_s27 = sshll.u32 %s1017_s8, 4  ;;  %s520_s27 = int_to_ptr.hbm [resolvable:$true] %s519_s27 }
   0x7   :  { %v698_v13 = vld [vmem:[%s1010_s1 + $0x8] sm:$0xff]  ;;  %v50_v15 = vsel %vm46_vm0, %v693_v12, 0.0  ;;  %v65_v17 = vsel %vm46_vm0, %v703_v14, 0.0  ;;  %v714_v18 = vld [vmem:[%s1010_s1 + $0x30] sm:$0xff]  ;;  %v735_v24 = vld [vmem:[%s1009_s0 + $0x38] sm:$0xff]  ;;  %s613_s28 = smov 128  }
   0x8   :  { %v74_v16 = vsel %vm46_vm0, %v698_v13, 0.0  ;;  %v719_v19 = vld [vmem:[%s1009_s0 + $0x10] sm:$0xff]  ;;  %v89_v21 = vsel %vm46_vm0, %v714_v18, 0.0  ;;  %v740_v25 = vld [vmem:[%s1010_s1 + $0x38] sm:$0xff]  ;;  %v68_v27 = vsel %vm46_vm0, %v735_v24, 0.0  ;;  %s614_s29 = smov 8  }
   0x9   :  { %v724_v20 = vld [vmem:[%s1010_s1 + $0x10] sm:$0xff]  ;;  %v53_v22 = vsel %vm46_vm0, %v719_v19, 0.0  ;;  %v745_v26 = vld [vmem:[%s1009_s0 + $0x18] sm:$0xff]  ;;  %v92_v28 = vsel %vm46_vm0, %v740_v25, 0.0 }
   0xa   :  { %v77_v23 = vsel %vm46_vm0, %v724_v20, 0.0  ;;  %v56_v29 = vsel %vm46_vm0, %v745_v26, 0.0  ;;  %v756_v30 = vld [vmem:[%s1010_s1 + $0x18] sm:$0xff] }
   0xb   :  { %84 = vadd.xlane.f32.xlu0 %v83_v9  ;;  %87 = vadd.xlane.f32.xlu2 %v86_v11  ;;  %v80_v31 = vsel %vm46_vm0, %v756_v30, 0.0 }
   0xc   :  { %72 = vadd.xlane.f32.xlu1 %v71_v10 }
  0x13   :  { %51 = vadd.xlane.f32.xlu0 %v50_v15  ;;  %66 = vadd.xlane.f32.xlu2 %v65_v17 }
  0x14   :  { %75 = vadd.xlane.f32.xlu1 %v74_v16 }
  0x1b   :  { %90 = vadd.xlane.f32.xlu0 %v89_v21  ;;  %78 = vadd.xlane.f32.xlu2 %v77_v23 }
  0x1c   :  { %54 = vadd.xlane.f32.xlu1 %v53_v22 }
  0x23   :  { %69 = vadd.xlane.f32.xlu0 %v68_v27  ;;  %57 = vadd.xlane.f32.xlu2 %v56_v29 }
  0x24   :  { %93 = vadd.xlane.f32.xlu1 %v92_v28 }
  0x2b   :  { %81 = vadd.xlane.f32.xlu0 %v80_v31 }
  0x76   :  { %v61_v32 = vpop.xlane.xlu0 %60  ;;  %v64_v34 = vpop.xlane.xlu2 %63 }
  0x77   :  { %v49_v33 = vpop.xlane.xlu1 %48 }
  0x7e   :  { %v85_v35 = vpop.xlane.xlu0 %84  ;;  %v88_v39 = vpop.xlane.xlu2 %87 }
  0x7f   :  { %v73_v36 = vpop.xlane.xlu1 %72  ;;  %v99_v37 = vadd.f32 %v85_v35, %v61_v32  ;;  %v100_v40 = vadd.f32 %v88_v39, %v64_v34 }
  0x80   :  { %v95_v38 = vadd.f32 %v73_v36, %v49_v33 }
  0x81   :  { %v107_v41 = vmul.f32 0.0078125, %v99_v37  ;;  %v108_v43 = vmul.f32 0.0078125, %v100_v40 }
  0x82   :  { %v103_v42 = vmul.f32 0.0078125, %v95_v38 }
  0x83   :  { %v760_v44 = vsub.f32 %v34_v0, %v107_v41  ;;  %v762_v45 = vsub.f32 %v42_v6, %v107_v41  ;;  %v775_v51 = vsub.f32 %v669_v2, %v108_v43  ;;  %v781_v59 = vsub.f32 %v684_v8, %v108_v43 }
  0x84   :  { %v764_v46 = vsub.f32 %v30_v1, %v103_v42  ;;  %v772_v50 = vsub.f32 %v38_v7, %v103_v42 }
  0x85   :  { %v163_v47 = vmul.f32 %v762_v45, %v762_v45  ;;  %v131_v48 = vmul.f32 %v760_v44, %v760_v44  ;;  %v132_v61 = vmul.f32 %v775_v51, %v775_v51  ;;  %v164_v63 = vmul.f32 %v781_v59, %v781_v59 }
  0x86   :  { %v127_v49 = vmul.f32 %v764_v46, %v764_v46  ;;  %v52_v52 = vpop.xlane.xlu0 %51  ;;  %v67_v57 = vpop.xlane.xlu2 %66  ;;  %v159_v62 = vmul.f32 %v772_v50, %v772_v50 }
  0x87   :  { %v76_v53 = vpop.xlane.xlu1 %75  ;;  %v179_v54 = vsel %vm46_vm0, %v163_v47, 0.0  ;;  %v147_v55 = vsel %vm46_vm0, %v131_v48, 0.0  ;;  %v150_v5 = vsel %vm46_vm0, %v132_v61, 0.0  ;;  %v182_v8 = vsel %vm46_vm0, %v164_v63, 0.0  ;;  %v363_v61 = vld [vmem:[%s1015_s6 + $0x20] sm:$0xff]  ;;  %v362_v63 = vld [vmem:[%s1015_s6 + $0x18] sm:$0xff] }
  0x88   :  { %v135_v56 = vsel %vm46_vm0, %v127_v49, 0.0  ;;  %v96_v58 = vadd.f32 %v76_v53, %v52_v52  ;;  %180 = vadd.xlane.f32.xlu2 %v179_v54  ;;  %148 = vadd.xlane.f32.xlu1 %v147_v55  ;;  %v167_v6 = vsel %vm46_vm0, %v159_v62, 0.0  ;;  %v366_v54 = vld [vmem:[%s1015_s6 + $0x38] sm:$0xff]  ;;  %v373_v55 = vld [vmem:[%s1016_s7 + $0x30] sm:$0xff] }
  0x89   :  { %136 = vadd.xlane.f32.xlu0 %v135_v56  ;;  %555 = vmatpush.msra.mxu3 %v366_v54  ;;  %v365_v56 = vld [vmem:[%s1015_s6 + $0x30] sm:$0xff]  ;;  %v370_v62 = vld [vmem:[%s1016_s7 + $0x18] sm:$0xff] }
  0x8a   :  { %v104_v60 = vmul.f32 0.0078125, %v96_v58  ;;  %472 = vmatpush.msra.mxu1 %v366_v54  ;;  %v364_v58 = vld [vmem:[%s1015_s6 + $0x28] sm:$0xff] }
  0x8b   :  { %556 = vmatpush.msra.mxu3 %v365_v56 }
  0x8c   :  { %v790_v0 = vsub.f32 %v693_v12, %v104_v60  ;;  %v793_v1 = vsub.f32 %v698_v13, %v104_v60  ;;  %473 = vmatpush.msra.mxu1 %v365_v56  ;;  %v371_v60 = vld [vmem:[%s1016_s7 + $0x20] sm:$0xff] }
  0x8d   :  { %557 = vmatpush.msra.mxu3 %v364_v58 }
  0x8e   :  { %v91_v2 = vpop.xlane.xlu0 %90  ;;  %v79_v7 = vpop.xlane.xlu2 %78  ;;  %v160_v11 = vmul.f32 %v793_v1, %v793_v1  ;;  %v128_v12 = vmul.f32 %v790_v0, %v790_v0  ;;  %474 = vmatpush.msra.mxu1 %v364_v58 }
  0x8f   :  { %v55_v3 = vpop.xlane.xlu1 %54  ;;  %v101_v4 = vadd.f32 %v91_v2, %v67_v57  ;;  %v372_v57 = vld [vmem:[%s1016_s7 + $0x28] sm:$0xff]  ;;  %558 = vmatpush.msra.mxu3 %v363_v61  ;;  %v369_v2 = vld [vmem:[%s1016_s7 + $0x10] sm:$0xff] }
  0x90   :  { %151 = vadd.xlane.f32.xlu2 %v150_v5  ;;  %168 = vadd.xlane.f32.xlu1 %v167_v6  ;;  %v97_v9 = vadd.f32 %v79_v7, %v55_v3  ;;  %v170_v21 = vsel %vm46_vm0, %v160_v11, 0.0  ;;  %v138_v22 = vsel %vm46_vm0, %v128_v12, 0.0  ;;  %v361_v3 = vld [vmem:[%s1015_s6 + $0x10] sm:$0xff]  ;;  %v360_v5 = vld [vmem:[%s1015_s6 + $0x8] sm:$0xff]  ;;  %v367_v6 = vld [vmem:[%s1016_s7] sm:$0xff] }
  0x91   :  { %v109_v10 = vmul.f32 0.0078125, %v101_v4  ;;  %183 = vadd.xlane.f32.xlu0 %v182_v8  ;;  %475 = vmatpush.msra.mxu1 %v363_v61  ;;  %v368_v4 = vld [vmem:[%s1016_s7 + $0x8] sm:$0xff]  ;;  %v359_v7 = vld [vmem:[%s1015_s6] sm:$0xff] }
  0x92   :  { %v105_v13 = vmul.f32 0.0078125, %v97_v9  ;;  %559 = vmatpush.msra.mxu3 %v362_v63 }
  0x93   :  { %v803_v15 = vsub.f32 %v703_v14, %v109_v10  ;;  %v816_v29 = vsub.f32 %v714_v18, %v109_v10  ;;  %476 = vmatpush.msra.mxu1 %v362_v63  ;;  %v917_v63 = vld [vmem:[%s1014_s5] ss:$0 sm:$0xff] }
  0x94   :  { %v806_v16 = vsub.f32 %v719_v19, %v105_v13  ;;  %v813_v23 = vsub.f32 %v724_v20, %v105_v13  ;;  %560 = vmatpush.msra.mxu3 %v361_v3 }
  0x95   :  { %v133_v17 = vmul.f32 %v803_v15, %v803_v15  ;;  %v165_v20 = vmul.f32 %v816_v29, %v816_v29  ;;  %477 = vmatpush.msra.mxu1 %v361_v3  ;;  %v923_v3 = vld [vmem:[%s1013_s4] ss:$0 sm:$0xff] }
  0x96   :  { %v70_v27 = vpop.xlane.xlu0 %69  ;;  %v129_v32 = vmul.f32 %v806_v16, %v806_v16  ;;  %v161_v33 = vmul.f32 %v813_v23, %v813_v23  ;;  %v58_v34 = vpop.xlane.xlu2 %57  ;;  %561 = vmatpush.msra.mxu3 %v360_v5 }
  0x97   :  { %v94_v28 = vpop.xlane.xlu1 %93  ;;  %v153_v14 = vsel %vm46_vm0, %v133_v17, 0.0  ;;  %v185_v39 = vsel %vm46_vm0, %v165_v20, 0.0  ;;  %478 = vmatpush.msra.mxu1 %v360_v5 }
  0x98   :  { %v102_v31 = vadd.f32 %v94_v28, %v70_v27  ;;  %171 = vadd.xlane.f32.xlu2 %v170_v21  ;;  %139 = vadd.xlane.f32.xlu1 %v138_v22  ;;  %v141_v36 = vsel %vm46_vm0, %v129_v32, 0.0  ;;  %v173_v37 = vsel %vm46_vm0, %v161_v33, 0.0 }
  0x99   :  { %154 = vadd.xlane.f32.xlu0 %v153_v14  ;;  %562 = vmatpush.msra.mxu3 %v359_v7 }
  0x9a   :  { %v110_v19 = vmul.f32 0.0078125, %v102_v31  ;;  %479 = vmatpush.msra.mxu1 %v359_v7 }
  0x9c   :  { %v826_v18 = vsub.f32 %v735_v24, %v110_v19  ;;  %v829_v35 = vsub.f32 %v740_v25, %v110_v19 }
  0x9e   :  { %v82_v38 = vpop.xlane.xlu0 %81  ;;  %v166_v42 = vmul.f32 %v829_v35, %v829_v35  ;;  %v134_v24 = vmul.f32 %v826_v18, %v826_v18 }
  0x9f   :  { %v98_v40 = vadd.f32 %v82_v38, %v58_v34 }
  0xa0   :  { %186 = vadd.xlane.f32.xlu1 %v185_v39  ;;  %142 = vadd.xlane.f32.xlu2 %v141_v36  ;;  %v188_v47 = vsel %vm46_vm0, %v166_v42, 0.0  ;;  %v156_v48 = vsel %vm46_vm0, %v134_v24, 0.0 }
  0xa1   :  { %174 = vadd.xlane.f32.xlu0 %v173_v37  ;;  %v106_v41 = vmul.f32 0.0078125, %v98_v40 }
  0xa3   :  { %v839_v25 = vsub.f32 %v745_v26, %v106_v41  ;;  %v842_v43 = vsub.f32 %v756_v30, %v106_v41  ;;  %v374_v30 = vld [vmem:[%s1016_s7 + $0x38] sm:$0xff] }
  0xa4   :  { %547 = vmatpush.msra.mxu2 %v374_v30  ;;  %407 = vmatpush.msra.mxu0 %v374_v30  ;;  %v911_v30 = vld [vmem:[%s1011_s2] ss:$0 sm:$0xff]  ;;  %s612_s2 = smov [#allocation2]  }
  0xa5   :  { %v130_v49 = vmul.f32 %v839_v25, %v839_v25  ;;  %v162_v53 = vmul.f32 %v842_v43, %v842_v43  ;;  %s517_s4 = sshll.u32 %s612_s2, 4  ;;  %s518_s4 = int_to_ptr.vmem [resolvable:$true] %s517_s4 }
  0xa6   :  { %548 = vmatpush.msra.mxu2 %v373_v55  ;;  %408 = vmatpush.msra.mxu0 %v373_v55 }
  0xa7   :  { %v144_v52 = vsel %vm46_vm0, %v130_v49, 0.0  ;;  %v176_v26 = vsel %vm46_vm0, %v162_v53, 0.0 }
  0xa8   :  { %189 = vadd.xlane.f32.xlu2 %v188_v47  ;;  %157 = vadd.xlane.f32.xlu1 %v156_v48 }
  0xa9   :  { %145 = vadd.xlane.f32.xlu0 %v144_v52  ;;  %549 = vmatpush.msra.mxu2 %v372_v57 }
  0xaa   :  { %409 = vmatpush.msra.mxu0 %v372_v57 }
  0xab   :  { %550 = vmatpush.msra.mxu2 %v371_v60 }
  0xac   :  { %410 = vmatpush.msra.mxu0 %v371_v60 }
  0xad   :  { %551 = vmatpush.msra.mxu2 %v370_v62 }
  0xae   :  { %411 = vmatpush.msra.mxu0 %v370_v62 }
  0xaf   :  { %552 = vmatpush.msra.mxu2 %v369_v2 }
  0xb0   :  { %177 = vadd.xlane.f32.xlu1 %v176_v26  ;;  %412 = vmatpush.msra.mxu0 %v369_v2  ;;  %v906_v26 = vld [vmem:[%s1012_s3] ss:$0 sm:$0xff] }
  0xb1   :  { %553 = vmatpush.msra.mxu2 %v368_v4 }
  0xb2   :  { %413 = vmatpush.msra.mxu0 %v368_v4 }
  0xb3   :  { %554 = vmatpush.msra.mxu2 %v367_v6 }
  0xb4   :  { %414 = vmatpush.msra.mxu0 %v367_v6 }
  0xfb   :  { %v181_v8 = vpop.xlane.xlu2 %180  ;;  %v149_v9 = vpop.xlane.xlu1 %148 }
  0xfc   :  { %v137_v10 = vpop.xlane.xlu0 %136  ;;  %v195_v11 = vadd.f32 %v181_v8, %v149_v9 }
  0xfe   :  { %v203_v12 = vmul.f32 0.0078125, %v195_v11 }
 0x100   :  { %v211_v13 = vadd.f32 1e-05, %v203_v12 }
 0x102   :  { %570 = vrsqrt.f32 %v211_v13  ;;  %vm261_vm2 = vweird.f32 %v211_v13 }
 0x103   :  { %v152_v17 = vpop.xlane.xlu2 %151  ;;  %v169_v21 = vpop.xlane.xlu1 %168 }
 0x104   :  { %v184_v22 = vpop.xlane.xlu0 %183  ;;  %v191_v27 = vadd.f32 %v169_v21, %v137_v10 }
 0x105   :  { %v196_v28 = vadd.f32 %v184_v22, %v152_v17 }
 0x106   :  { %v199_v14 = vmul.f32 0.0078125, %v191_v27 }
 0x107   :  { %v204_v31 = vmul.f32 0.0078125, %v196_v28 }
 0x108   :  { %v571_v19 = vpop.eup %570  ;;  %v207_v32 = vadd.f32 1e-05, %v199_v14 }
 0x109   :  { %v256_v33 = vmul.f32 %v571_v19, %v211_v13  ;;  %v212_v20 = vadd.f32 1e-05, %v204_v31  ;;  %vm262_vm1 = vweird.f32 %v571_v19 }
 0x10a   :  { %572 = vrsqrt.f32 %v207_v32  ;;  %vm263_vm3 = vmor %vm261_vm2, %vm262_vm1  ;;  %vm221_vm6 = vweird.f32 %v207_v32 }
 0x10b   :  { %v257_v34 = vmul.f32 %v571_v19, %v256_v33  ;;  %574 = vrsqrt.f32 %v212_v20  ;;  %v172_v36 = vpop.xlane.xlu2 %171  ;;  %v140_v37 = vpop.xlane.xlu1 %139  ;;  %vm271_vm7 = vweird.f32 %v212_v20 }
 0x10c   :  { %v155_v38 = vpop.xlane.xlu0 %154  ;;  %v192_v39 = vadd.f32 %v172_v36, %v140_v37 }
 0x10d   :  { %v258_v40 = vmul.f32 0.5, %v257_v34 }
 0x10e   :  { %v200_v41 = vmul.f32 0.0078125, %v192_v39 }
 0x10f   :  { %v259_v42 = vsub.f32 1.5, %v258_v40 }
 0x110   :  { %v573_v24 = vpop.eup %572  ;;  %v900_v47 = vadd.f32 1e-05, %v200_v41 }
 0x111   :  { %v575_v48 = vpop.eup %574  ;;  %v260_v49 = vmul.f32 %v571_v19, %v259_v42  ;;  %v216_v52 = vmul.f32 %v573_v24, %v207_v32  ;;  %vm222_vm5 = vweird.f32 %v573_v24 }
 0x112   :  { %v266_v53 = vmul.f32 %v575_v48, %v212_v20  ;;  %576 = vrsqrt.f32 %v900_v47  ;;  %vm272_vm4 = vweird.f32 %v575_v48  ;;  %vm223_vm8 = vmor %vm221_vm6, %vm222_vm5  ;;  %vm231_vm11 = vweird.f32 %v900_v47 }
 0x113   :  { %v217_v54 = vmul.f32 %v573_v24, %v216_v52  ;;  %v143_v55 = vpop.xlane.xlu2 %142  ;;  %v187_v56 = vpop.xlane.xlu1 %186  ;;  %v264_v57 = vsel %vm263_vm3, %v571_v19, %v260_v49  ;;  %vm273_vm9 = vmor %vm271_vm7, %vm272_vm4 }
 0x114   :  { %v267_v58 = vmul.f32 %v575_v48, %v266_v53  ;;  %v175_v60 = vpop.xlane.xlu0 %174  ;;  %v197_v61 = vadd.f32 %v187_v56, %v155_v38  ;;  %v333_v62 = vmul.f32 %v264_v57, %v762_v45  ;;  %v303_v2 = vmul.f32 %v264_v57, %v760_v44 }
 0x115   :  { %v218_v4 = vmul.f32 0.5, %v217_v54  ;;  %v193_v5 = vadd.f32 %v175_v60, %v143_v55 }
 0x116   :  { %v268_v6 = vmul.f32 0.5, %v267_v58  ;;  %v205_v7 = vmul.f32 0.0078125, %v197_v61  ;;  %v344_v8 = vmul.f32 %v906_v26, %v333_v62  ;;  %v314_v45 = vmul.f32 %v911_v30, %v303_v2 }
 0x117   :  { %v219_v9 = vsub.f32 1.5, %v218_v4  ;;  %v201_v10 = vmul.f32 0.0078125, %v193_v5 }
 0x118   :  { %v577_v11 = vpop.eup %576  ;;  %v269_v12 = vsub.f32 1.5, %v268_v6  ;;  %v927_v44 = vadd.f32 1e-05, %v205_v7  ;;  %v355_v13 = vadd.f32 %v917_v63, %v344_v8  ;;  %v325_v17 = vadd.f32 %v923_v3, %v314_v45 }
 0x119   :  { %v220_v21 = vmul.f32 %v573_v24, %v219_v9  ;;  %v226_v22 = vmul.f32 %v577_v11, %v900_v47  ;;  %v932_v27 = vadd.f32 1e-05, %v201_v10  ;;  %vm232_vm10 = vweird.f32 %v577_v11 }
 0x11a   :  { %v270_v28 = vmul.f32 %v575_v48, %v269_v12  ;;  %578 = vrsqrt.f32 %v927_v44  ;;  %535 = vmatmul.msk.f32.vlgmr.msra.gmra.mxu2 %vm46_vm0, %v355_v13  ;;  %543 = vmatmul.msk.f32.vlgmr.msra.gmra.mxu3 %vm46_vm0, %v325_v17  ;;  %vm233_vm12 = vmor %vm231_vm11, %vm232_vm10  ;;  %vm281_vm15 = vweird.f32 %v927_v44 }
 0x11b   :  { %v227_v14 = vmul.f32 %v577_v11, %v226_v22  ;;  %580 = vrsqrt.f32 %v932_v27  ;;  %v190_v31 = vpop.xlane.xlu2 %189  ;;  %v158_v19 = vpop.xlane.xlu1 %157  ;;  %v224_v32 = vsel %vm223_vm8, %v573_v24, %v220_v21  ;;  %vm241_vm1 = vweird.f32 %v932_v27 }
 0x11c   :  { %v198_v33 = vadd.f32 %v190_v31, %v158_v19  ;;  %v329_v34 = vmul.f32 %v224_v32, %v772_v50  ;;  %v274_v36 = vsel %vm273_vm9, %v575_v48, %v270_v28  ;;  %v299_v20 = vmul.f32 %v224_v32, %v764_v46  ;;  %v146_v56 = vpop.xlane.xlu0 %145 }
 0x11d   :  { %v228_v37 = vmul.f32 0.5, %v227_v14  ;;  %v334_v38 = vmul.f32 %v274_v36, %v781_v59  ;;  %v304_v39 = vmul.f32 %v274_v36, %v775_v51 }
 0x11e   :  { %v206_v40 = vmul.f32 0.0078125, %v198_v33  ;;  %v340_v41 = vmul.f32 %v906_v26, %v329_v34  ;;  %v310_v42 = vmul.f32 %v911_v30, %v299_v20 }
 0x11f   :  { %v229_v49 = vsub.f32 1.5, %v228_v37  ;;  %v345_v24 = vmul.f32 %v906_v26, %v334_v38  ;;  %v315_v52 = vmul.f32 %v911_v30, %v304_v39 }
 0x120   :  { %v579_v50 = vpop.eup %578  ;;  %v947_v48 = vadd.f32 1e-05, %v206_v40  ;;  %v351_v46 = vadd.f32 %v917_v63, %v340_v41  ;;  %v321_v59 = vadd.f32 %v923_v3, %v310_v42 }
 0x121   :  { %v581_v53 = vpop.eup %580  ;;  %v230_v51 = vmul.f32 %v577_v11, %v229_v49  ;;  %v276_v54 = vmul.f32 %v579_v50, %v927_v44  ;;  %v356_v55 = vadd.f32 %v917_v63, %v345_v24  ;;  %v326_v60 = vadd.f32 %v923_v3, %v315_v52 }
 0x122   :  { %v236_v57 = vmul.f32 %v581_v53, %v932_v27  ;;  %582 = vrsqrt.f32 %v947_v48  ;;  %531 = vmatmul.msk.f32.vlgmr.msra.gmra.mxu0 %vm46_vm0, %v351_v46  ;;  %539 = vmatmul.msk.f32.vlgmr.msra.gmra.mxu1 %vm46_vm0, %v321_v59  ;;  %vm242_vm13 = vweird.f32 %v581_v53  ;;  %vm282_vm14 = vweird.f32 %v579_v50 }
 0x123   :  { %v277_v58 = vmul.f32 %v579_v50, %v276_v54  ;;  %536 = vmatmul.msk.f32.gmra.mxu2 %vm46_vm0, %v356_v55  ;;  %v178_v47 = vpop.xlane.xlu1 %177  ;;  %v234_v61 = vsel %vm233_vm12, %v577_v11, %v230_v51  ;;  %544 = vmatmul.msk.f32.gmra.mxu3 %vm46_vm0, %v326_v60  ;;  %vm283_vm2 = vmor %vm281_vm15, %vm282_vm14  ;;  %vm291_vm5 = vweird.f32 %v947_v48 }
 0x124   :  { %v237_v62 = vmul.f32 %v581_v53, %v236_v57  ;;  %v194_v2 = vadd.f32 %v178_v47, %v146_v56  ;;  %v330_v4 = vmul.f32 %v234_v61, %v793_v1  ;;  %v300_v5 = vmul.f32 %v234_v61, %v790_v0  ;;  %vm243_vm3 = vmor %vm241_vm1, %vm242_vm13 }
 0x125   :  { %v278_v6 = vmul.f32 0.5, %v277_v58 }
 0x126   :  { %v238_v7 = vmul.f32 0.5, %v237_v62  ;;  %v202_v8 = vmul.f32 0.0078125, %v194_v2  ;;  %v341_v45 = vmul.f32 %v906_v26, %v330_v4  ;;  %v311_v9 = vmul.f32 %v911_v30, %v300_v5 }
 0x127   :  { %v279_v10 = vsub.f32 1.5, %v278_v6 }
 0x128   :  { %v583_v12 = vpop.eup %582  ;;  %v239_v11 = vsub.f32 1.5, %v238_v7  ;;  %v210_v13 = vadd.f32 1e-05, %v202_v8  ;;  %v352_v17 = vadd.f32 %v917_v63, %v341_v45  ;;  %v322_v1 = vadd.f32 %v923_v3, %v311_v9 }
 0x129   :  { %v280_v0 = vmul.f32 %v579_v50, %v279_v10  ;;  %v286_v21 = vmul.f32 %v583_v12, %v947_v48  ;;  %vm292_vm4 = vweird.f32 %v583_v12 }
 0x12a   :  { %v240_v22 = vmul.f32 %v581_v53, %v239_v11  ;;  %584 = vrsqrt.f32 %v210_v13  ;;  %532 = vmatmul.msk.f32.gmra.mxu0 %vm46_vm0, %v352_v17  ;;  %540 = vmatmul.msk.f32.gmra.mxu1 %vm46_vm0, %v322_v1  ;;  %vm293_vm6 = vmor %vm291_vm5, %vm292_vm4  ;;  %vm251_vm8 = vweird.f32 %v210_v13 }
 0x12b   :  { %v287_v28 = vmul.f32 %v583_v12, %v286_v21  ;;  %v284_v14 = vsel %vm283_vm2, %v579_v50, %v280_v0 }
 0x12c   :  { %v244_v31 = vsel %vm243_vm3, %v581_v53, %v240_v22  ;;  %v335_v19 = vmul.f32 %v284_v14, %v816_v29  ;;  %v305_v44 = vmul.f32 %v284_v14, %v803_v15 }
 0x12d   :  { %v288_v32 = vmul.f32 0.5, %v287_v28  ;;  %v331_v33 = vmul.f32 %v244_v31, %v813_v23  ;;  %v301_v27 = vmul.f32 %v244_v31, %v806_v16 }
 0x12e   :  { %v346_v34 = vmul.f32 %v906_v26, %v335_v19  ;;  %v316_v36 = vmul.f32 %v911_v30, %v305_v44 }
 0x12f   :  { %v289_v20 = vsub.f32 1.5, %v288_v32  ;;  %v342_v37 = vmul.f32 %v906_v26, %v331_v33  ;;  %v312_v38 = vmul.f32 %v911_v30, %v301_v27 }
 0x130   :  { %v585_v39 = vpop.eup %584  ;;  %v357_v29 = vadd.f32 %v917_v63, %v346_v34  ;;  %v327_v15 = vadd.f32 %v923_v3, %v316_v36 }
 0x131   :  { %v290_v40 = vmul.f32 %v583_v12, %v289_v20  ;;  %v246_v23 = vmul.f32 %v585_v39, %v210_v13  ;;  %v353_v16 = vadd.f32 %v917_v63, %v342_v37  ;;  %v323_v41 = vadd.f32 %v923_v3, %v312_v38 }
 0x132   :  { %537 = vmatmul.msk.f32.gmra.mxu2 %vm46_vm0, %v357_v29  ;;  %545 = vmatmul.msk.f32.gmra.mxu3 %vm46_vm0, %v327_v15  ;;  %vm252_vm7 = vweird.f32 %v585_v39 }
 0x133   :  { %v247_v42 = vmul.f32 %v585_v39, %v246_v23  ;;  %533 = vmatmul.msk.f32.gmra.mxu0 %vm46_vm0, %v353_v16  ;;  %v294_v49 = vsel %vm293_vm6, %v583_v12, %v290_v40  ;;  %541 = vmatmul.msk.f32.gmra.mxu1 %vm46_vm0, %v323_v41  ;;  %vm253_vm9 = vmor %vm251_vm8, %vm252_vm7 }
 0x134   :  { %v336_v24 = vmul.f32 %v294_v49, %v829_v35  ;;  %v306_v52 = vmul.f32 %v294_v49, %v826_v18 }
 0x135   :  { %v248_v50 = vmul.f32 0.5, %v247_v42 }
 0x136   :  { %v347_v48 = vmul.f32 %v906_v26, %v336_v24  ;;  %v317_v46 = vmul.f32 %v911_v30, %v306_v52 }
 0x137   :  { %v249_v59 = vsub.f32 1.5, %v248_v50 }
 0x138   :  { %v358_v53 = vadd.f32 %v917_v63, %v347_v48  ;;  %v328_v51 = vadd.f32 %v923_v3, %v317_v46 }
 0x139   :  { %v250_v54 = vmul.f32 %v585_v39, %v249_v59 }
 0x13a   :  { %538 = vmatmul.msk.f32.gmra.mxu2 %vm46_vm0, %v358_v53  ;;  %546 = vmatmul.msk.f32.gmra.mxu3 %vm46_vm0, %v328_v51 }
 0x13b   :  { %v254_v35 = vsel %vm253_vm9, %v585_v39, %v250_v54 }
 0x13c   :  { %v332_v18 = vmul.f32 %v254_v35, %v842_v43  ;;  %v302_v55 = vmul.f32 %v254_v35, %v839_v25 }
 0x13e   :  { %v343_v56 = vmul.f32 %v906_v26, %v332_v18  ;;  %v313_v57 = vmul.f32 %v911_v30, %v302_v55 }
 0x140   :  { %v354_v58 = vadd.f32 %v917_v63, %v343_v56  ;;  %v324_v60 = vadd.f32 %v923_v3, %v313_v57 }
 0x142   :  { %534 = vmatmul.msk.f32.gmra.mxu0 %vm46_vm0, %v354_v58  ;;  %542 = vmatmul.msk.f32.gmra.mxu1 %vm46_vm0, %v324_v60 }
 0x19d   :  { %v428_v47 = vpop.f32.mrf.mxu2  ;;  %v493_v61 = vpop.f32.mrf.mxu3 }
 0x19e   :  { %v494_v62 = vadd.f32 %v493_v61, %v428_v47 }
 0x19f   :  { %v416_v2 = vpop.f32.mrf.mxu0  ;;  %v481_v4 = vpop.f32.mrf.mxu1 }
 0x1a0   :  { %509 = vst [vmem:[#allocation2 + $0x20] sm:$0xff] %v494_v62  ;;  %v482_v43 = vadd.f32 %v481_v4, %v416_v2 }
 0x1a2   :  { %505 = vst [vmem:[#allocation2] sm:$0xff] %v482_v43 }
 0x1a6   :  { %v431_v25 = vpop.f32.mrf.mxu2  ;;  %v496_v30 = vpop.f32.mrf.mxu3 }
 0x1a7   :  { %v419_v26 = vpop.f32.mrf.mxu0  ;;  %v484_v5 = vpop.f32.mrf.mxu1  ;;  %v497_v63 = vadd.f32 %v496_v30, %v431_v25 }
 0x1a8   :  { %v485_v6 = vadd.f32 %v484_v5, %v419_v26 }
 0x1a9   :  { %510 = vst [vmem:[#allocation2 + $0x28] sm:$0xff] %v497_v63 }
 0x1aa   :  { %506 = vst [vmem:[#allocation2 + $0x8] sm:$0xff] %v485_v6 }
 0x1b0   :  { %v422_v3 = vpop.f32.mrf.mxu0  ;;  %v487_v7 = vpop.f32.mrf.mxu1 }
 0x1b1   :  { %v488_v8 = vadd.f32 %v487_v7, %v422_v3 }
 0x1b3   :  { %507 = vst [vmem:[#allocation2 + $0x10] sm:$0xff] %v488_v8 }
 0x1b5   :  { %v434_v45 = vpop.f32.mrf.mxu2  ;;  %v499_v9 = vpop.f32.mrf.mxu3 }
 0x1b6   :  { %v500_v10 = vadd.f32 %v499_v9, %v434_v45 }
 0x1b8   :  { %511 = vst [vmem:[#allocation2 + $0x30] sm:$0xff] %v500_v10 }
 0x1bd   :  { %v437_v12 = vpop.f32.mrf.mxu2  ;;  %v502_v11 = vpop.f32.mrf.mxu3 }
 0x1be   :  { %v503_v13 = vadd.f32 %v502_v11, %v437_v12 }
 0x1bf   :  { %v425_v17 = vpop.f32.mrf.mxu0  ;;  %v490_v1 = vpop.f32.mrf.mxu1 }
 0x1c0   :  { %512 = vst [vmem:[#allocation2 + $0x38] sm:$0xff] %v503_v13  ;;  %v491_v0 = vadd.f32 %v490_v1, %v425_v17 }
 0x1c2   :  { %508 = vst [vmem:[#allocation2 + $0x18] sm:$0xff] %v491_v0 }
 0x1c3   :  { %525 = dma.vmem_to_hbm [thread:$0]  %s518_s4, 1024, %s520_s27, [#allocation3], %s613_s28, %s613_s28, %s614_s29  }
 0x1c4   :  { %610 = dma.done.wait [#allocation3], 1024  }
 0x1c5   :  { %611 = vsyncadd [#allocation3], 4294966272 }
 0x1c6   :  { %530 = vsyncpa [#allocation3], 1 }

</bundles_post_ra>
